<compile_context>
chip_gen: v6e
topology: v6e:2x2x1
jax: 0.10.0
libtpu: 0.0.40
codegen_flags: <defaults>
</compile_context>

<pallas_src>
import jax
import jax.numpy as jnp
from jax.experimental import pallas as pl
from jax.experimental.pallas import tpu as pltpu


def _copy_kernel(x_ref, o_ref):
    # Identity copy of one (1, N) block; squeeze has no math.
    o_ref[...] = x_ref[...]


def prims_squeeze(a: jax.Array) -> jax.Array:
    # Semantics of torch.ops.prims.squeeze(a, dimensions=[0, 4, 1]):
    # each listed dim must have size 1; they are removed, others kept in order.
    squeeze_dims = (0, 1, 4)  # sorted; all static, checked at trace time
    for d in squeeze_dims:
        assert a.shape[d] == 1, f"prims.squeeze: dim {d} has size {a.shape[d]} != 1"
    out_shape = tuple(s for i, s in enumerate(a.shape) if i not in squeeze_dims)

    # Flatten to a contiguous (1, N) view on the wrapper side (metadata-only).
    n = 1
    for s in out_shape:
        n *= s
    flat_in = a.reshape(1, n)

    nbytes = n * jnp.dtype(a.dtype).itemsize

    # Gridless pallas_call: whole array lives in VMEM, one un-pipelined copy.
    # Output aliases the input buffer (in-place identity from XLA's view).
    flat_out = pl.pallas_call(
        _copy_kernel,
        out_shape=jax.ShapeDtypeStruct((1, n), a.dtype),
        in_specs=[pl.BlockSpec(memory_space=pltpu.MemorySpace.VMEM)],
        out_specs=pl.BlockSpec(memory_space=pltpu.MemorySpace.VMEM),
        input_output_aliases={0: 0},
        cost_estimate=pl.CostEstimate(
            flops=0, transcendentals=0, bytes_accessed=2 * nbytes
        ),
    )(flat_in)

    # Metadata-only reshape back to the squeezed shape [2, 3, 4].
    return flat_out.reshape(out_shape)


if __name__ == "__main__":
    key = jax.random.PRNGKey(0)
    # Shape dictated by the module's annotate_args: [1, 1, 2, 3, 1, 4] float32.
    x = jax.random.normal(key, (1, 1, 2, 3, 1, 4), dtype=jnp.float32)

    out = prims_squeeze(x)
    out = jax.block_until_ready(out)

    ref = jnp.squeeze(x, axis=(0, 1, 4))
    assert out.shape == (2, 3, 4), out.shape
    assert out.dtype == jnp.float32
    assert jnp.array_equal(out, ref), "mismatch vs reference squeeze"

    print("KERNEL_OK")
</pallas_src>

<mosaic_0001>
module attributes {stable_mosaic.version = 11 : i64} {
  func.func @_copy_kernel(%arg0: memref<1x24xf32, #tpu.memory_space<vmem>>, %arg1: memref<1x24xf32, #tpu.memory_space<vmem>>) attributes {dimension_semantics = [], scalar_prefetch = 0 : i64, scratch_operands = 0 : i64, tpu.core_type = #tpu.core_type<tc>} {
    %c0 = arith.constant 0 : index
    %c0_0 = arith.constant 0 : index
    %0 = vector.load %arg0[%c0, %c0_0] : memref<1x24xf32, #tpu.memory_space<vmem>>, vector<1x24xf32>
    %c0_1 = arith.constant 0 : index
    %c0_2 = arith.constant 0 : index
    %1 = vector.load %arg1[%c0_1, %c0_2] : memref<1x24xf32, #tpu.memory_space<vmem>>, vector<1x24xf32>
    tpu.vector_store %arg1[%c0_1, %c0_2], %0 {strides = array<i32>} : memref<1x24xf32, #tpu.memory_space<vmem>>, vector<1x24xf32>,
    return
  }
}

</mosaic_0001>

<bundles_post_ra>
// kernel: tpu_custom_call.1
= control target key start
LH: loop header
LB: loop body
LE: loop exit
PB: predicated region body
PF: predicated region fallthrough
CT: control target
= control target key end

     0   :  { %6 = vsyncpa [#allocation3], 0  ;;  %s103_s0 = inlined_call_operand.hbm [shape: f32[1,24], index: 0, kind: input, shape index: {}, may-alias: {0,1}]   ;;  %s104_s1 = inlined_call_operand.hbm [shape: f32[1,24], index: 1, kind: output, shape index: {}, may-alias: {0,1}]  }
   0x1   :  { %7 = vsyncpa [#allocation4], 0  ;;  %s85_s6 = smov [#allocation2]  }
   0x2   :  { %s14_s7 = sshll.u32 %s85_s6, 4  ;;  %s15_s7 = int_to_ptr.vmem [resolvable:$true] %s14_s7 }
   0x3   :  { %s49_s8 = scalar_lea.vmem %s15_s7, 16  ;;  %s53_s9 = scalar_lea.vmem %s15_s7, 32 }
   0x4   :  { %p50_p0 = scmp.ne.s32.totalorder %s15_s7, %s49_s8  ;;  %p54_p1 = scmp.lt.s32.totalorder %s15_s7, %s15_s7 }
   0x5   :  { %p55_p2 = scmp.lt.s32.totalorder %s53_s9, %s49_s8 }
   0x7   :  { %p56_p3 = por %p55_p2, %p54_p1 }
   0x9   :  { %p57_p4 = pnand %p56_p3, %p50_p0 }
   0xb   :  { %60 = shalt.err (!%p57_p4)
}
   0xc   :  { %17 = dma.hbm_to_vmem [thread:$0]  %s103_s0, 16, %s15_s7, [#allocation3]  }
   0xd   :  { %81 = dma.done.wait [#allocation3], 16  }
   0xe   :  { %82 = vsyncadd [#allocation3], 4294967280  ;;  %s86_s12 = smov [#allocation5]   ;;  %vm22_vm0 = vcmask 188416   ;;  %v21_v0 = vld [vmem:[#allocation2] sm:$0x1] }
   0xf   :  { %s30_s13 = sshll.u32 %s86_s12, 4  ;;  %23 = vst.msk [vmem:[#allocation5] sm:$0x1] %vm22_vm0, %v21_v0  ;;  %s31_s13 = int_to_ptr.vmem [resolvable:$true] %s30_s13 }
  0x10   :  { %s61_s14 = scalar_lea.vmem %s31_s13, 16  ;;  %s65_s15 = scalar_lea.vmem %s31_s13, 32 }
  0x11   :  { %p62_p5 = scmp.ne.s32.totalorder %s31_s13, %s61_s14  ;;  %p66_p6 = scmp.lt.s32.totalorder %s31_s13, %s31_s13 }
  0x12   :  { %p67_p7 = scmp.lt.s32.totalorder %s65_s15, %s61_s14 }
  0x14   :  { %p68_p8 = por %p67_p7, %p66_p6 }
  0x16   :  { %p69_p9 = pnand %p68_p8, %p62_p5 }
  0x18   :  { %72 = shalt.err (!%p69_p9)
}
  0x19   :  { %33 = dma.vmem_to_hbm [thread:$0]  %s31_s13, 16, %s104_s1, [#allocation4]  }
  0x1a   :  { %83 = dma.done.wait [#allocation4], 16  }
  0x1b   :  { %84 = vsyncadd [#allocation4], 4294967280 }
  0x1c   :  { %37 = vsyncpa [#allocation3], 1 }
  0x1d   :  { %38 = vsyncpa [#allocation4], 1 }

</bundles_post_ra>
